<compile_context>
chip_gen: v6e
topology: v6e:2x2x1
jax: 0.10.0
libtpu: 0.0.40
codegen_flags: <defaults>
</compile_context>

<pallas_src>
from functools import partial

import jax
import jax.numpy as jnp
from jax.experimental import pallas as pl
from jax.experimental.pallas import tpu as pltpu

_LANE = 128
_SUBLANE = 8
_TARGET_GT_BLOCK_BYTES = 2 * 1024 * 1024  # ~2 MiB gt tile per grid step


# ---------------------------------------------------------------------------
# Pallas kernel: fused mask_sparse + mask_range
#   s = gt.sum(axis=1)                        (channel reduction, per pixel)
#   mask = where((s > 0) [& (lo <= s <= hi)], mask, 0)
# ---------------------------------------------------------------------------
def _mask_kernel(gt_ref, mask_ref, out_ref, *, use_sparse, use_range, lo, hi):
    # gt_ref: (1, C, TH, 128)   mask_ref/out_ref: (1, TH, 128)
    # C is a leading block dim -> the channel sum is plain VPU adds (no XLU).
    # Accumulate in f32 for threshold stability (matches f32 torch reference).
    s = jnp.sum(gt_ref[...].astype(jnp.float32), axis=1)        # (1, TH, 128)
    cond = None
    if use_sparse:
        cond = s > 0
    if use_range:
        rng = (s >= lo) & (s <= hi)
        cond = rng if cond is None else (cond & rng)
    m = mask_ref[...]
    if cond is None:                     # unreachable via wrapper early-return
        out_ref[...] = m
    else:
        out_ref[...] = jnp.where(cond, m, jnp.zeros_like(m))


def pallas_apply_masks(mask, gt, *, flag_mask_sparse, flag_mask_range):
    """Fused BaseLoss.mask_sparse + BaseLoss.mask_range on TPU."""
    if mask is None:
        return None
    if not flag_mask_sparse and flag_mask_range is None:
        return mask

    B, C, H, W = gt.shape
    assert mask.shape == (B, H, W)
    use_range = flag_mask_range is not None
    lo, hi = ((float(flag_mask_range[0]), float(flag_mask_range[1]))
              if use_range else (0.0, 0.0))

    # ---- lane-dense spatial layout: fold (H, W) into rows x 128 lanes ----
    S = H * W
    rows = -(-S // _LANE)                                   # ceil(S / 128)
    itemsize = jnp.dtype(gt.dtype).itemsize
    th = _TARGET_GT_BLOCK_BYTES // max(1, C * _LANE * itemsize)
    th = max(_SUBLANE, (th // _SUBLANE) * _SUBLANE)         # multiple of 8
    if rows <= th:
        th = rows                       # single spatial tile (full-extent block ok)
        rows_pad = rows
    else:
        rows_pad = -(-rows // th) * th  # pad so spatial tiles divide evenly
    S_pad = rows_pad * _LANE

    gt_flat = gt.reshape(B, C, S)
    mask_flat = mask.reshape(B, S)
    if S_pad != S:
        # Zero padding is safe: padded pixels are sliced off after the kernel.
        gt_flat = jnp.pad(gt_flat, ((0, 0), (0, 0), (0, S_pad - S)))
        mask_flat = jnp.pad(mask_flat, ((0, 0), (0, S_pad - S)))
    gt_r = gt_flat.reshape(B, C, rows_pad, _LANE)
    mask_r = mask_flat.reshape(B, rows_pad, _LANE)

    kernel = partial(_mask_kernel, use_sparse=bool(flag_mask_sparse),
                     use_range=use_range, lo=lo, hi=hi)

    out_r = pl.pallas_call(
        kernel,
        out_shape=jax.ShapeDtypeStruct(mask_r.shape, mask_r.dtype),
        # Spatial axis leading: plenty of parallel steps even when B is 1-2.
        grid=(rows_pad // th, B),
        in_specs=[
            pl.BlockSpec((1, C, th, _LANE), lambda r, b: (b, 0, r, 0)),  # gt
            pl.BlockSpec((1, th, _LANE), lambda r, b: (b, r, 0)),        # mask
        ],
        out_specs=pl.BlockSpec((1, th, _LANE), lambda r, b: (b, r, 0)),
        input_output_aliases={1: 0},      # in-place mask update (mask *= ...)
        compiler_params=pltpu.CompilerParams(
            dimension_semantics=("parallel", "parallel")),
    )(gt_r, mask_r)

    out = out_r.reshape(B, S_pad)
    if S_pad != S:
        out = out[:, :S]
    return out.reshape(B, H, W)


# ---------------------------------------------------------------------------
# BaseLoss port (glue in plain JAX, hot path in Pallas)
# ---------------------------------------------------------------------------
class BaseLossPallas:
    def __init__(self, cfg=None):
        cfg = cfg or {}
        self.gamma = cfg.get('gamma', 1.0)
        self.weight = cfg.get('weight', 1.0)
        self.scales = cfg.get('scales', 99)
        self.flag_mask_sparse = cfg.get('mask_sparse', False)
        self.flag_mask_range = cfg.get('mask_range', None)

    def forward(self, *args, **kwargs):
        raise NotImplementedError(
            'Forward not implemented for {}'.format(type(self).__name__))

    def get_weights(self, scales):
        return [self.weight * self.gamma ** i for i in range(scales)]

    def get_scales(self, scales):
        return min(self.scales, len(scales))

    # TODO(synk): dynamic-size nearest/bilinear(align_corners=True) resize has
    # no clean Pallas equivalent (data-dependent gather); kept in plain JAX.
    @staticmethod
    def interp(dst, src, method):
        if dst is None or dst.ndim == 3:
            return dst
        assert dst.ndim == src.ndim
        if dst.ndim == 4 and dst.shape[-2:] != src.shape[-2:]:
            dst = jax.image.resize(
                dst, dst.shape[:2] + src.shape[-2:], method=method)
        return dst

    def interp_bilinear(self, dst, src):
        return self.interp(dst, src, 'bilinear')

    def interp_nearest(self, dst, src):
        return self.interp(dst, src, 'nearest')

    def mask_sparse(self, mask, gt):
        if mask is None or not self.flag_mask_sparse:
            return mask
        return pallas_apply_masks(mask, gt,
                                  flag_mask_sparse=True, flag_mask_range=None)

    def mask_range(self, mask, gt):
        if mask is None or self.flag_mask_range is None:
            return mask
        return pallas_apply_masks(mask, gt, flag_mask_sparse=False,
                                  flag_mask_range=self.flag_mask_range)

    def apply_masks(self, mask, gt):
        """Fused mask_sparse + mask_range (single Pallas kernel launch)."""
        return pallas_apply_masks(mask, gt,
                                  flag_mask_sparse=self.flag_mask_sparse,
                                  flag_mask_range=self.flag_mask_range)

    @staticmethod
    def flatten(pred, gt, mask=None, soft_mask=None):
        # Layout glue: NCHW -> NHWC -> (B*H*W, C), matches torch semantics.
        if pred.ndim == 4:
            pred = jnp.transpose(pred, (0, 2, 3, 1))
        pred = pred.reshape(-1, pred.shape[-1])
        if gt.ndim == 4:
            gt = jnp.transpose(gt, (0, 2, 3, 1))
        gt = gt.reshape(-1, gt.shape[-1])
        if mask is not None:
            if mask.ndim == 4:
                mask = jnp.transpose(mask, (0, 2, 3, 1))
            mask = mask.reshape(-1)
        if soft_mask is not None:
            if soft_mask.ndim == 4:
                soft_mask = jnp.transpose(soft_mask, (0, 2, 3, 1))
            soft_mask = soft_mask.reshape(-1)
        return pred, gt, mask, soft_mask


# ---------------------------------------------------------------------------
if __name__ == "__main__":
    key = jax.random.PRNGKey(0)
    k1, k2, k3, k4, k5 = jax.random.split(key, 5)

    cfg = {'gamma': 0.5, 'weight': 1.0, 'scales': 4,
           'mask_sparse': True, 'mask_range': (0.5, 6.0)}
    loss = BaseLossPallas(cfg)

    # --- test 1: H*W is a multiple of 128 (lane-dense path, no padding) ---
    B, C, H, W = 2, 4, 16, 16
    gt = jax.random.uniform(k1, (B, C, H, W), jnp.float32, minval=-0.5, maxval=2.0)
    pred = jax.random.normal(k2, (B, C, H, W), jnp.float32)
    mask = (jax.random.uniform(k3, (B, H, W)) > 0.3).astype(jnp.float32)

    masked = jax.block_until_ready(loss.apply_masks(mask, gt))
    s = gt.sum(axis=1)
    ref = mask * (s > 0) * ((s >= 0.5) & (s <= 6.0))
    assert jnp.allclose(masked, ref, atol=1e-6), "mismatch vs reference (fused)"

    # sparse-only / range-only method paths
    m_sp = jax.block_until_ready(loss.mask_sparse(mask, gt))
    assert jnp.allclose(m_sp, mask * (s > 0), atol=1e-6), "mismatch (sparse)"
    m_rg = jax.block_until_ready(loss.mask_range(mask, gt))
    assert jnp.allclose(m_rg, mask * ((s >= 0.5) & (s <= 6.0)), atol=1e-6), \
        "mismatch (range)"

    # --- test 2: H*W NOT a multiple of 128 (exercise zero-pad path) ---
    H2, W2 = 10, 10
    gt2 = jax.random.uniform(k4, (B, C, H2, W2), jnp.float32, minval=-0.5, maxval=2.0)
    mask2 = (jax.random.uniform(k5, (B, H2, W2)) > 0.3).astype(jnp.float32)
    masked2 = jax.block_until_ready(loss.apply_masks(mask2, gt2))
    s2 = gt2.sum(axis=1)
    ref2 = mask2 * (s2 > 0) * ((s2 >= 0.5) & (s2 <= 6.0))
    assert jnp.allclose(masked2, ref2, atol=1e-6), "mismatch vs reference (padded)"

    # --- glue paths ---
    p_f, g_f, m_f, _ = loss.flatten(pred, gt, mask[:, None])  # (B*H*W, C), (B*H*W,)
    assert p_f.shape == (B * H * W, C) and m_f.shape == (B * H * W,)
    assert loss.get_weights(3) == [1.0, 0.5, 0.25]
    assert loss.get_scales([0, 1, 2, 3, 4, 5]) == 4

    print("KERNEL_OK")
</pallas_src>

<mosaic_0001>
module attributes {stable_mosaic.version = 11 : i64} {
  func.func @_mask_kernel(%arg0: i32, %arg1: i32, %arg2: memref<1x4x2x128xf32, #tpu.memory_space<vmem>>, %arg3: memref<1x2x128xf32, #tpu.memory_space<vmem>>, %arg4: memref<1x2x128xf32, #tpu.memory_space<vmem>>) attributes {dimension_semantics = [#tpu.dimension_semantics<parallel>, #tpu.dimension_semantics<parallel>], iteration_bounds = array<i64: 1, 2>, scalar_prefetch = 0 : i64, scratch_operands = 0 : i64, tpu.core_type = #tpu.core_type<tc>, window_params = [{transform_indices = @transform_0, window_bounds = array<i64: 1, 4, 2, 128>}, {transform_indices = @transform_1, window_bounds = array<i64: 1, 2, 128>}, {transform_indices = @transform_2, window_bounds = array<i64: 1, 2, 128>}]} {
    %c0 = arith.constant 0 : index
    %c0_0 = arith.constant 0 : index
    %c0_1 = arith.constant 0 : index
    %c0_2 = arith.constant 0 : index
    %0 = vector.load %arg2[%c0, %c0_0, %c0_1, %c0_2] : memref<1x4x2x128xf32, #tpu.memory_space<vmem>>, vector<1x4x2x128xf32>
    %cst = arith.constant dense<0.000000e+00> : vector<1x2x128xf32>
    %1 = vector.multi_reduction <add>, %0, %cst [1] : vector<1x4x2x128xf32> to vector<1x2x128xf32>
    %cst_3 = arith.constant 0.000000e+00 : f32
    %2 = vector.broadcast %cst_3 : f32 to vector<1x2x128xf32>
    %3 = arith.cmpf ogt, %1, %2 : vector<1x2x128xf32>
    %cst_4 = arith.constant 5.000000e-01 : f32
    %4 = vector.broadcast %cst_4 : f32 to vector<1x2x128xf32>
    %5 = arith.cmpf oge, %1, %4 : vector<1x2x128xf32>
    %cst_5 = arith.constant 6.000000e+00 : f32
    %6 = vector.broadcast %cst_5 : f32 to vector<1x2x128xf32>
    %7 = arith.cmpf ole, %1, %6 : vector<1x2x128xf32>
    %8 = arith.andi %5, %7 : vector<1x2x128xi1>
    %9 = arith.andi %3, %8 : vector<1x2x128xi1>
    %c0_6 = arith.constant 0 : index
    %c0_7 = arith.constant 0 : index
    %c0_8 = arith.constant 0 : index
    %10 = vector.load %arg3[%c0_6, %c0_7, %c0_8] : memref<1x2x128xf32, #tpu.memory_space<vmem>>, vector<1x2x128xf32>
    %cst_9 = arith.constant 0.000000e+00 : f32
    %11 = vector.broadcast %cst_9 : f32 to vector<1x2x128xf32>
    %12 = arith.select %9, %10, %11 : vector<1x2x128xi1>, vector<1x2x128xf32>
    %c0_10 = arith.constant 0 : index
    %c0_11 = arith.constant 0 : index
    %c0_12 = arith.constant 0 : index
    %13 = vector.load %arg4[%c0_10, %c0_11, %c0_12] : memref<1x2x128xf32, #tpu.memory_space<vmem>>, vector<1x2x128xf32>
    tpu.vector_store %arg4[%c0_10, %c0_11, %c0_12], %12 {strides = array<i32>} : memref<1x2x128xf32, #tpu.memory_space<vmem>>, vector<1x2x128xf32>,
    return
  }
  func.func @transform_0(%arg0: i32, %arg1: i32) -> (i32, i32, i32, i32) {
    %c0_i32 = arith.constant 0 : i32
    %c0_i32_0 = arith.constant 0 : i32
    %c0_i32_1 = arith.constant 0 : i32
    return %arg1, %c0_i32, %arg0, %c0_i32_0 : i32, i32, i32, i32
  }
  func.func @transform_1(%arg0: i32, %arg1: i32) -> (i32, i32, i32) {
    %c0_i32 = arith.constant 0 : i32
    %c0_i32_0 = arith.constant 0 : i32
    return %arg1, %arg0, %c0_i32 : i32, i32, i32
  }
  func.func @transform_2(%arg0: i32, %arg1: i32) -> (i32, i32, i32) {
    %c0_i32 = arith.constant 0 : i32
    %c0_i32_0 = arith.constant 0 : i32
    return %arg1, %arg0, %c0_i32 : i32, i32, i32
  }
}

</mosaic_0001>

<bundles_post_ra>
// kernel: tpu_custom_call.1
= control target key start
LH: loop header
LB: loop body
LE: loop exit
PB: predicated region body
PF: predicated region fallthrough
CT: control target
= control target key end

     0   :  { %7 = vsyncpa [#allocation3], 0  ;;  %s776_s0 = inlined_call_operand.hbm [shape: f32[2,4,2,128], index: 0, kind: input, shape index: {}]   ;;  %s777_s1 = inlined_call_operand.hbm [shape: f32[2,2,128], index: 1, kind: input, shape index: {}, may-alias: {1,2}]   ;;  %s778_s2 = inlined_call_operand.hbm [shape: f32[2,2,128], index: 2, kind: output, shape index: {}, may-alias: {1,2}]  }
   0x1   :  { %9 = vsyncpa [#allocation3 + $0x1], 0 }
   0x2   :  { %10 = vsyncpa [#allocation6], 0 }
   0x3   :  { %12 = vsyncpa [#allocation6 + $0x1], 0 }
   0x4   :  { %13 = vsyncpa [#allocation4], 0 }
   0x5   :  { %15 = vsyncpa [#allocation4 + $0x1], 0  ;;  %s608_s9 = smov 0   ;;  %s610_s10 = smov 0  }
   0x6   :  { %s612_s11 = smov 0   ;;  %s614_s12 = smov 0  }
   0x7   :  { %s616_s13 = smov 0   ;;  %s618_s14 = smov 0  }
   0x8 LB: > { %s359_s15 = sadd.s32 4294967295, %s586_s14   ;;  %s360_s16 = sadd.s32 4294967294, %s586_s14   ;;  %s586_s14 = sphi %s618_s14, %s21_s14   ;;  %s582_s13 = sphi %s616_s13, %s790_s13   ;;  %s578_s12 = sphi %s614_s12, %s789_s12   ;;  %s574_s11 = sphi %s612_s11, %s788_s11   ;;  %s570_s10 = sphi %s610_s10, %s787_s10   ;;  %s566_s9 = sphi %s608_s9, %s786_s9  }
   0x9   : > { %s30_s17 = sadd.s32 1, %s582_s13  ;;  %s42_s18 = sadd.s32 1, %s574_s11 }
   0xa   : > { %p31_p0 = scmp.ge.s32.totalorder %s30_s17, 2  ;;  %p49_p1 = scmp.ne.s32.totalorder %s574_s11, %s570_s10 }
   0xb   : > { %p50_p2 = scmp.eq.s32.totalorder %s586_s14, 0  ;;  %p55_p3 = scmp.ne.s32.totalorder %s570_s10, %s566_s9 }
   0xc   : > { %s792_s17 = smov (%p31_p0, %s30_s17), 0  ;;  %p56_p5 = scmp.eq.s32.totalorder %s359_s15, 0 }
   0xd   : > { %p649_p4 = por %p50_p2, %p49_p1  ;;  %s37_s20 = ssub.s32 %s582_s13, %s792_s17 }
   0xe   : > { %p109_p6 = scmp.eq.s32.totalorder %s359_s15, 1  ;;  %p40_p7 = scmp.eq.s32.totalorder %s37_s20, 0 }
   0xf   : > { %p655_p8 = por %p56_p5, %p55_p3  ;;  %p115_p10 = scmp.eq.s32.totalorder %s360_s16, 1 }
  0x10   : > { %p659_p9 = por %p109_p6, %p49_p1  ;;  %p394_p13 = scmp.lt.s32.totalorder %s586_s14, 2 }
  0x11   : > { %s664_s23 = scalar_select %p40_p7, %s574_s11, %s42_s18  }
  0x12   : > { %p666_p11 = por %p115_p10, %p55_p3  ;;  %s673_s25 = sand.u32 1, %s574_s11  }
  0x13   : > { %s363_s26 = sshll.u32 %s673_s25, 3  ;;  %s376_s27 = sshll.u32 %s582_s13, 7 }
  0x14   : > { %s146_s30 = scalar_lea.hbm %s776_s0, %s376_s27  ;;  %s139_s3 = scalar_lea.vmem [#allocation2], %s363_s26 }
  0x15   : > { %s147_s4 = sshll.u32 %s139_s3, 4  ;;  %p682_p0 = pnand %p394_p13, %p649_p4  ;;  %s148_s4 = int_to_ptr.vmem [resolvable:$true] %s147_s4 }
  0x16   : > { %p368_p1 = scmp.ge.s32.totalorder %s586_s14, 1  ;;  %s136_s6 = scalar_lea.sflag [#allocation3], %s673_s25 }
  0x17   : > { %p448_p2 = pneg %p682_p0  ;;  %s459_s7 = scalar_lea.vmem %s148_s4, 128 }
  0x18   : > { %p460_p3 = scmp.ne.s32.totalorder %s148_s4, %s459_s7  ;;  %s588_s8 = smov [#allocation2]  }
  0x19   : > { %s464_s15 = sshll.u32 %s588_s8, 4  ;;  %s465_s15 = int_to_ptr.vmem [resolvable:$false] %s464_s15 }
  0x1a   : > { %p462_p5 = pnand %p460_p3, %p448_p2  ;;  %s466_s16 = scalar_lea.vmem %s465_s15, 256 }
  0x1b   : > { %p467_p4 = scmp.lt.s32.totalorder %s148_s4, %s465_s15  ;;  %p468_p7 = scmp.lt.s32.totalorder %s466_s16, %s459_s7 }
  0x1c   : > { %p463_p6 = pneg %p462_p5 }
  0x1d   : > { %p469_p10 = por %p468_p7, %p467_p4 }
  0x1f   : > { %p470_p13 = pnand %p469_p10, %p463_p6 }
  0x21   : > { %473 = shalt.err (!%p470_p13)
}
  0x22   : > { %s589_s18 = smov 32   ;;  %s590_s19 = smov 2  }
  0x23   : > { %386 = dma.hbm_to_vmem [thread:$0]  (!%p682_p0), %s146_s30, 128, %s148_s4, %s136_s6, %s589_s18, %s589_s18, %s590_s19  }
  0x24   : > { %p174_p3 = scmp.lt.s32.totalorder %s586_s14, 3  ;;  %s366_s20 = sshll.u32 %s673_s25, 1 }
  0x25   : > { %s367_s26 = sshll.u32 %s582_s13, 5  ;;  %s161_s7 = scalar_lea.vmem [#allocation5], %s366_s20 }
  0x26   : > { %p700_p5 = pnand %p368_p1, %p174_p3  ;;  %s167_s3 = scalar_lea.hbm %s777_s1, %s367_s26 }
  0x27   : > { %s169_s8 = sshll.u32 %s161_s7, 4  ;;  %s158_s15 = scalar_lea.sflag [#allocation6], %s673_s25  ;;  %s170_s8 = int_to_ptr.vmem [resolvable:$true] %s169_s8 }
  0x28   : > { %s487_s16 = scalar_lea.vmem %s170_s8, 32  ;;  %s591_s30 = smov [#allocation5]  }
  0x29   : > { %p488_p6 = scmp.ne.s32.totalorder %s170_s8, %s487_s16  ;;  %s492_s4 = sshll.u32 %s591_s30, 4  ;;  %s493_s4 = int_to_ptr.vmem [resolvable:$false] %s492_s4 }
  0x2a   : > { %s494_s6 = scalar_lea.vmem %s493_s4, 64  ;;  %p495_p1 = scmp.lt.s32.totalorder %s170_s8, %s493_s4 }
  0x2b   : > { %p490_p4 = pnand %p488_p6, %p448_p2  ;;  %p496_p10 = scmp.lt.s32.totalorder %s494_s6, %s487_s16 }
  0x2d   : > { %p491_p7 = pneg %p490_p4  ;;  %p497_p13 = por %p496_p10, %p495_p1 }
  0x2f   : > { %p498_p3 = pnand %p497_p13, %p491_p7 }
  0x31   : > { %501 = shalt.err (!%p498_p3)
}
  0x32   : > { %389 = dma.hbm_to_vmem [thread:$0]  (!%p682_p0), %s167_s3, 32, %s170_s8, %s158_s15  }
  0x33   : > { %178 = sbr.rel (%p700_p5) target bundleno = 86 (0x56), region = 28  ;;  %s716_s25 = sand.u32 (!%p700_p5), 1, %s570_s10  }
  0x34   : > { %s369_s18 = sshll.u32 (!%p700_p5), %s716_s25, 3  ;;  %s181_s19 = scalar_lea.sflag (!%p700_p5), [#allocation3], %s716_s25 }
  0x35   : > { %s184_s20 = scalar_lea.vmem (!%p700_p5), [#allocation2], %s369_s18 }
  0x38   : > { %553 = dma.done.wait (%p655_p8), %s181_s19, 128  }
  0x39   : > { %555 = vsyncadd (%p655_p8), %s181_s19, 4294967168  ;;  %s370_s5 = sshll.u32 %s716_s25, 1  ;;  %s190_s26 = scalar_lea.sflag [#allocation6], %s716_s25 }
  0x3a   : > { %s193_s27 = scalar_lea.vmem [#allocation5], %s370_s5 }
  0x3b   : > { %557 = dma.done.wait (%p655_p8), %s190_s26, 32  }
  0x3c   : > { %559 = vsyncadd (%p655_p8), %s190_s26, 4294967264  ;;  %vm223_vm0 = vcmask 1041408   ;;  %v219_v0 = vld [vmem:[%s184_s20] sm:$0x3]  ;;  %v220_v1 = vld [vmem:[%s184_s20 + $0x2] sm:$0x3] }
  0x3d   : > { %v221_v2 = vld [vmem:[%s184_s20 + $0x4] sm:$0x3]  ;;  %v222_v3 = vld [vmem:[%s184_s20 + $0x6] sm:$0x3]  ;;  %v224_v4 = vsel %vm223_vm0, %v219_v0, 0.0  ;;  %v225_v5 = vsel %vm223_vm0, %v220_v1, 0.0 }
  0x3e   : > { %v227_v6 = vsel %vm223_vm0, %v221_v2, 0.0  ;;  %v226_v7 = vadd.f32 %v225_v5, %v224_v4  ;;  %v229_v8 = vsel %vm223_vm0, %v222_v3, 0.0  ;;  %s218_s28 = scalar_lea.vmem [#allocation7], %s370_s5  ;;  %s373_s3 = sshll.u32 %s578_s12, 5  ;;  %v236_v11 = vld [vmem:[%s193_s27] sm:$0x3] }
  0x3f   : > { %s254_s29 = sshll.u32 %s218_s28, 4  ;;  %s252_s8 = scalar_lea.hbm %s778_s2, %s373_s3  ;;  %s731_s29 = int_to_ptr.vmem [resolvable:$true] %s254_s29 }
  0x40   : > { %v228_v9 = vadd.f32 %v227_v6, %v226_v7  ;;  %s240_s15 = scalar_lea.sflag [#allocation4], %s716_s25  ;;  %s502_s16 = scalar_lea.vmem %s731_s29, 32 }
  0x41   : > { %p503_p8 = scmp.ne.s32.totalorder %s731_s29, %s502_s16  ;;  %s592_s12 = smov [#allocation7]  }
  0x42   : > { %v230_v10 = vadd.f32 %v229_v8, %v228_v9  ;;  %s506_s30 = sshll.u32 %s592_s12, 4  ;;  %s507_s30 = int_to_ptr.vmem [resolvable:$false] %s506_s30 }
  0x43   : > { %p504_p0 = pnand %p503_p8, %p659_p9  ;;  %s508_s4 = scalar_lea.vmem %s507_s30, 64 }
  0x44   : > { %vm231_vm1 = vcmp.gt.f32.partialorder %v230_v10, 0.0  ;;  %vm232_vm2 = vcmp.ge.f32.partialorder %v230_v10, 0.5  ;;  %vm233_vm3 = vcmp.le.f32.partialorder %v230_v10, 6.0  ;;  %p509_p5 = scmp.lt.s32.totalorder %s731_s29, %s507_s30  ;;  %p510_p6 = scmp.lt.s32.totalorder %s508_s4, %s502_s16 }
  0x45   : > { %vm234_vm4 = vmand %vm232_vm2, %vm233_vm3  ;;  %p505_p2 = pneg %p504_p0 }
  0x46   : > { %vm235_vm5 = vmand %vm231_vm1, %vm234_vm4  ;;  %p511_p4 = por %p510_p6, %p509_p5 }
  0x47   : > { %v237_v12 = vsel %vm235_vm5, %v236_v11, 0.0 }
  0x48   : > { %238 = vst [vmem:[%s218_s28] sm:$0x3] %v237_v12  ;;  %p512_p7 = pnand %p511_p4, %p505_p2 }
  0x4a   : > { %515 = shalt.err (!%p512_p7)
}
  0x4b   : > { %s516_s6 = scalar_lea.hbm %s252_s8, 32  ;;  %s520_s19 = scalar_lea.hbm %s778_s2, 64 }
  0x4c   : > { %p517_p1 = scmp.ne.s32.totalorder %s252_s8, %s516_s6  ;;  %p521_p3 = scmp.lt.s32.totalorder %s252_s8, %s778_s2 }
  0x4d   : > { %p522_p8 = scmp.lt.s32.totalorder %s520_s19, %s516_s6 }
  0x4e   : > { %p518_p10 = pnand %p517_p1, %p659_p9 }
  0x4f   : > { %p523_p0 = por %p522_p8, %p521_p3 }
  0x50   : > { %p519_p13 = pneg %p518_p10 }
  0x52   : > { %p524_p12 = pnand %p523_p0, %p519_p13 }
  0x54   : > { %527 = shalt.err (!%p524_p12)
}
  0x55   : > { %381 = dma.vmem_to_hbm [thread:$0]  (%p659_p9), %s731_s29, 32, %s252_s8, %s240_s15  }
  0x56 PF: > { %s266_s26 = sand.u32 1, %s566_s9   ;;  %p785_p2 = scmp.ge.s32.totalorder %s586_s14, 2 }
  0x57   : > { %s267_s27 = scalar_lea.sflag [#allocation4], %s266_s26 }
  0x58   : > { %p391_p5 = pnand %p785_p2, %p666_p11 }
  0x5a   : > { %p392_p6 = pneg %p391_p5 }
  0x5c   : > { %561 = dma.done.wait (%p392_p6), %s267_s27, 32  }
  0x5d   : > { %563 = vsyncadd (%p392_p6), %s267_s27, 4294967264  ;;  %s21_s14 = sadd.s32 1, %s586_s14   ;;  %s786_s9 = smov %s570_s10 }
  0x5e   : > { %p18_p4 = scmp.ge.s32.totalorder %s21_s14, 4   ;;  %s787_s10 = smov %s574_s11 }
  0x5f   : > { %s788_s11 = smov %s664_s23  ;;  %s789_s12 = smov %s582_s13 }
  0x60   : > { %s790_s13 = smov %s792_s17  ;;  %20 = sbr.rel (!%p18_p4) target bundleno = 8 (0x8), region = 86 }
  0x65   :  { %272 = vsyncpa [#allocation3], 1 }
  0x66   :  { %274 = vsyncpa [#allocation3 + $0x1], 1 }
  0x67   :  { %275 = vsyncpa [#allocation6], 1 }
  0x68   :  { %277 = vsyncpa [#allocation6 + $0x1], 1 }
  0x69   :  { %278 = vsyncpa [#allocation4], 1 }
  0x6a   :  { %280 = vsyncpa [#allocation4 + $0x1], 1 }

</bundles_post_ra>
